<compile_context>
chip_gen: v6e
topology: v6e:2x2x1
jax: 0.10.0
libtpu: 0.0.40
codegen_flags: <defaults>
</compile_context>

<pallas_src>
import functools

import jax
import jax.numpy as jnp
from jax.experimental import pallas as pl
from jax.experimental.pallas import tpu as pltpu


def _act(h, activation):
    if activation == "sin":
        return jnp.sin(h)
    # Any other string -> LeakyReLU(0.01), matching the PyTorch module's
    # if/else (a typo'd activation name silently becomes LeakyReLU).
    return jnp.where(h > 0, h, 0.01 * h)


def subnet_kernel(x_ref, *refs, activation, layers_num, mxu_bf16):
    # refs = (w1, b1, w2, b2, ..., wL, bL, out)
    out_ref = refs[-1]
    param_refs = refs[:-1]

    x = x_ref[...]                      # (1, N_block) f32, samples on lanes

    # ---- Layer 0: Linear(1, hidden) + activation, on the VPU (f32) --------
    w1 = param_refs[0][...]             # (hidden, 1)
    b1 = param_refs[1][...]             # (hidden, 1)
    h = _act(w1 * x + b1, activation)   # broadcast MAC -> (hidden, N_block)
    # TODO(synk): nn.Dropout is train-only; forward here is eval-mode identity.

    # ---- Layers 1..L-1: Linear (+ activation except on the last) ----------
    for i in range(1, layers_num):
        w = param_refs[2 * i][...]      # (fan_out, fan_in)
        b = param_refs[2 * i + 1][...]  # (fan_out, 1)
        if mxu_bf16:
            # bf16 operands -> single-pass MXU; f32 accumulate keeps error tiny.
            acc = jnp.dot(w.astype(jnp.bfloat16), h.astype(jnp.bfloat16),
                          preferred_element_type=jnp.float32)
        else:
            acc = jnp.dot(w, h, preferred_element_type=jnp.float32)
        h = acc + b
        if i != layers_num - 1:
            h = _act(h, activation)

    out_ref[...] = h.astype(out_ref.dtype)  # (output_dim, N_block), lane-dense


def make_subnet_params(key, layers_num, hidden_dim, output_dim):
    """Xavier-normal weights (stored as (fan_out, fan_in)), zero biases (fan_out, 1)."""
    input_dim = 1
    dims = [input_dim] + [hidden_dim] * (layers_num - 1) + [output_dim]
    params = []
    for i in range(layers_num):
        fan_in, fan_out = dims[i], dims[i + 1]
        key, sub = jax.random.split(key)
        std = (2.0 / (fan_in + fan_out)) ** 0.5
        w = std * jax.random.normal(sub, (fan_out, fan_in), dtype=jnp.float32)
        b = jnp.zeros((fan_out, 1), dtype=jnp.float32)
        params += [w, b]
    return params


def _choose_n_block(n, requested):
    """Large lane-aligned block, but keep >=2 grid steps when N allows (v7x 2-TC)."""
    req = max(128, (int(requested) // 128) * 128)
    n_lanes = pl.cdiv(n, 128) * 128      # N rounded up to lane width
    req = min(req, n_lanes)              # never pad beyond one lane-rounded N
    if n_lanes >= 256:
        # Cap so the grid has at least two iterations to shard across cores.
        req = min(req, max(128, (n_lanes // 2 // 128) * 128))
    return req


def subnet_forward(x, params, *, layers_num, output_dim, activation="sin",
                   n_block=4096, mxu_bf16=True):
    """x: (N, 1) or (N,) scalar samples.  Returns (N, output_dim)."""
    assert layers_num >= 2, "kernel assumes at least input + output linear layers"
    x_flat = jnp.reshape(x, (-1,)).astype(jnp.float32)
    n = x_flat.shape[0]

    # Pick block size (large to amortize per-step overhead, >=2 steps if possible).
    n_block = _choose_n_block(n, n_block)
    n_pad = pl.cdiv(n, n_block) * n_block
    x_t = jnp.zeros((1, n_pad), jnp.float32).at[0, :n].set(x_flat)

    kernel = functools.partial(
        subnet_kernel, activation=activation, layers_num=layers_num,
        mxu_bf16=mxu_bf16,
    )

    grid = (n_pad // n_block,)
    in_specs = [pl.BlockSpec((1, n_block), lambda i: (0, i))]
    for p in params:
        # Full-array blocks with a constant index_map: weights stay VMEM-resident
        # across grid steps.  (pl.Buffered(1) would halve their double-buffer,
        # but at hidden=32 that saves only a few KB -- not worth the extra
        # lowering surface here.)
        in_specs.append(pl.BlockSpec(p.shape, lambda i: (0, 0)))

    out_t = pl.pallas_call(
        kernel,
        out_shape=jax.ShapeDtypeStruct((output_dim, n_pad), jnp.float32),
        grid=grid,
        in_specs=in_specs,
        out_specs=pl.BlockSpec((output_dim, n_block), lambda i: (0, i)),
        compiler_params=pltpu.CompilerParams(
            dimension_semantics=("parallel",),     # shard sample blocks on v7x's 2 TCs
            vmem_limit_bytes=32 * 1024 * 1024,     # ample headroom: live tiles <1 MiB
        ),
    )(x_t, *params)

    # TODO(synk): for an ensemble of many Subnets, stack weights on a new leading
    # grid axis (weights (S, out, in), grid=(S, n_blocks)) -- one pallas_call for
    # the whole ensemble is the real lever for MXU utilization / launch overhead.
    # Slice valid lanes first, then transpose only (output_dim, N).
    return out_t[:, :n].T                          # (N, output_dim)


def subnet_reference(x, params, *, layers_num, activation="sin"):
    """Pure-JAX f32 reference in PyTorch convention: y = x @ W.T + b."""
    h = jnp.reshape(x, (-1, 1)).astype(jnp.float32)
    for i in range(layers_num):
        w, b = params[2 * i], params[2 * i + 1]      # w: (out, in), b: (out, 1)
        h = h @ w.T + b[:, 0]
        if i != layers_num - 1:
            h = _act(h, activation)
    return h


if __name__ == "__main__":
    layers_num = 3
    hidden_dim = 32
    output_dim = 4
    activation = "sin"

    key = jax.random.PRNGKey(0)
    kx, kp = jax.random.split(key)
    params = make_subnet_params(kp, layers_num, hidden_dim, output_dim)

    # bf16 MXU operands with f32 accumulate -> loosen tolerance vs f32 reference.
    ATOL = 5e-2
    RTOL = 5e-2

    # Small case (padding path, single grid step).
    n_small = 8
    x_small = jax.random.normal(kx, (n_small, 1), dtype=jnp.float32)
    out_small = jax.block_until_ready(
        subnet_forward(x_small, params, layers_num=layers_num,
                       output_dim=output_dim, activation=activation)
    )
    ref_small = subnet_reference(x_small, params, layers_num=layers_num,
                                 activation=activation)
    assert out_small.shape == (n_small, output_dim)
    assert jnp.allclose(out_small, ref_small, atol=ATOL, rtol=RTOL), "small mismatch"

    # Larger case: non-multiple-of-block N; auto block sizing keeps >=2 grid steps.
    n_big = 1000
    x_big = jax.random.normal(jax.random.PRNGKey(1), (n_big, 1), dtype=jnp.float32)
    out_big = jax.block_until_ready(
        subnet_forward(x_big, params, layers_num=layers_num,
                       output_dim=output_dim, activation=activation)
    )
    ref_big = subnet_reference(x_big, params, layers_num=layers_num,
                               activation=activation)
    assert out_big.shape == (n_big, output_dim)
    assert jnp.allclose(out_big, ref_big, atol=ATOL, rtol=RTOL), "big mismatch"

    # Exact-semantics sanity check with f32 matmuls (tight tolerance).
    out_f32 = jax.block_until_ready(
        subnet_forward(x_big, params, layers_num=layers_num,
                       output_dim=output_dim, activation=activation,
                       mxu_bf16=False)
    )
    assert jnp.allclose(out_f32, ref_big, atol=1e-5, rtol=1e-5), "f32 path mismatch"

    print("KERNEL_OK")
</pallas_src>

<mosaic_0001>
module attributes {stable_mosaic.version = 11 : i64} {
  func.func @subnet_kernel(%arg0: i32, %arg1: memref<1x128xf32, #tpu.memory_space<vmem>>, %arg2: memref<32x1xf32, #tpu.memory_space<vmem>>, %arg3: memref<32x1xf32, #tpu.memory_space<vmem>>, %arg4: memref<32x32xf32, #tpu.memory_space<vmem>>, %arg5: memref<32x1xf32, #tpu.memory_space<vmem>>, %arg6: memref<4x32xf32, #tpu.memory_space<vmem>>, %arg7: memref<4x1xf32, #tpu.memory_space<vmem>>, %arg8: memref<4x128xf32, #tpu.memory_space<vmem>>) attributes {dimension_semantics = [#tpu.dimension_semantics<parallel>], iteration_bounds = array<i64: 1>, scalar_prefetch = 0 : i64, scratch_operands = 0 : i64, tpu.core_type = #tpu.core_type<tc>, window_params = [{transform_indices = @transform_0, window_bounds = array<i64: 1, 128>}, {pipeline_mode = #tpu.pipeline_mode<synchronous>, transform_indices = @transform_1, window_bounds = array<i64: 32, 1>}, {pipeline_mode = #tpu.pipeline_mode<synchronous>, transform_indices = @transform_2, window_bounds = array<i64: 32, 1>}, {pipeline_mode = #tpu.pipeline_mode<synchronous>, transform_indices = @transform_3, window_bounds = array<i64: 32, 32>}, {pipeline_mode = #tpu.pipeline_mode<synchronous>, transform_indices = @transform_4, window_bounds = array<i64: 32, 1>}, {pipeline_mode = #tpu.pipeline_mode<synchronous>, transform_indices = @transform_5, window_bounds = array<i64: 4, 32>}, {pipeline_mode = #tpu.pipeline_mode<synchronous>, transform_indices = @transform_6, window_bounds = array<i64: 4, 1>}, {transform_indices = @transform_7, window_bounds = array<i64: 4, 128>}]} {
    %c0 = arith.constant 0 : index
    %c0_0 = arith.constant 0 : index
    %0 = vector.load %arg1[%c0, %c0_0] : memref<1x128xf32, #tpu.memory_space<vmem>>, vector<1x128xf32>
    %c0_1 = arith.constant 0 : index
    %c0_2 = arith.constant 0 : index
    %1 = vector.load %arg2[%c0_1, %c0_2] : memref<32x1xf32, #tpu.memory_space<vmem>>, vector<32x1xf32>
    %c0_3 = arith.constant 0 : index
    %c0_4 = arith.constant 0 : index
    %2 = vector.load %arg3[%c0_3, %c0_4] : memref<32x1xf32, #tpu.memory_space<vmem>>, vector<32x1xf32>
    %3 = vector.broadcast %1 : vector<32x1xf32> to vector<32x128xf32>
    %4 = vector.broadcast %0 : vector<1x128xf32> to vector<32x128xf32>
    %5 = arith.mulf %3, %4 : vector<32x128xf32>
    %6 = vector.broadcast %2 : vector<32x1xf32> to vector<32x128xf32>
    %7 = arith.addf %5, %6 : vector<32x128xf32>
    %8 = math.sin %7 : vector<32x128xf32>
    %c0_5 = arith.constant 0 : index
    %c0_6 = arith.constant 0 : index
    %9 = vector.load %arg4[%c0_5, %c0_6] : memref<32x32xf32, #tpu.memory_space<vmem>>, vector<32x32xf32>
    %c0_7 = arith.constant 0 : index
    %c0_8 = arith.constant 0 : index
    %10 = vector.load %arg5[%c0_7, %c0_8] : memref<32x1xf32, #tpu.memory_space<vmem>>, vector<32x1xf32>
    %11 = arith.truncf %9 : vector<32x32xf32> to vector<32x32xbf16>
    %12 = arith.truncf %8 : vector<32x128xf32> to vector<32x128xbf16>
    %cst = arith.constant dense<0.000000e+00> : vector<32x128xf32>
    %13 = tpu.matmul %11, %12, %cst {dimension_numbers = #tpu.dot_dimension_numbers<[1], [0], [0], [1], [0, 0, 1, 1], [], []>} : vector<32x32xbf16>, vector<32x128xbf16>, vector<32x128xf32> -> vector<32x128xf32>
    %14 = vector.broadcast %10 : vector<32x1xf32> to vector<32x128xf32>
    %15 = arith.addf %13, %14 : vector<32x128xf32>
    %16 = math.sin %15 : vector<32x128xf32>
    %c0_9 = arith.constant 0 : index
    %c0_10 = arith.constant 0 : index
    %17 = vector.load %arg6[%c0_9, %c0_10] : memref<4x32xf32, #tpu.memory_space<vmem>>, vector<4x32xf32>
    %c0_11 = arith.constant 0 : index
    %c0_12 = arith.constant 0 : index
    %18 = vector.load %arg7[%c0_11, %c0_12] : memref<4x1xf32, #tpu.memory_space<vmem>>, vector<4x1xf32>
    %19 = arith.truncf %17 : vector<4x32xf32> to vector<4x32xbf16>
    %20 = arith.truncf %16 : vector<32x128xf32> to vector<32x128xbf16>
    %cst_13 = arith.constant dense<0.000000e+00> : vector<4x128xf32>
    %21 = tpu.matmul %19, %20, %cst_13 {dimension_numbers = #tpu.dot_dimension_numbers<[1], [0], [0], [1], [0, 0, 1, 1], [], []>} : vector<4x32xbf16>, vector<32x128xbf16>, vector<4x128xf32> -> vector<4x128xf32>
    %22 = vector.broadcast %18 : vector<4x1xf32> to vector<4x128xf32>
    %23 = arith.addf %21, %22 : vector<4x128xf32>
    %c0_14 = arith.constant 0 : index
    %c0_15 = arith.constant 0 : index
    %24 = vector.load %arg8[%c0_14, %c0_15] : memref<4x128xf32, #tpu.memory_space<vmem>>, vector<4x128xf32>
    tpu.vector_store %arg8[%c0_14, %c0_15], %23 {strides = array<i32>} : memref<4x128xf32, #tpu.memory_space<vmem>>, vector<4x128xf32>,
    return
  }
  func.func @transform_0(%arg0: i32) -> (i32, i32) {
    %c0_i32 = arith.constant 0 : i32
    %c0_i32_0 = arith.constant 0 : i32
    return %c0_i32, %arg0 : i32, i32
  }
  func.func @transform_1(%arg0: i32) -> (i32, i32) {
    %c0_i32 = arith.constant 0 : i32
    %c0_i32_0 = arith.constant 0 : i32
    %c0_i32_1 = arith.constant 0 : i32
    return %c0_i32, %c0_i32_0 : i32, i32
  }
  func.func @transform_2(%arg0: i32) -> (i32, i32) {
    %c0_i32 = arith.constant 0 : i32
    %c0_i32_0 = arith.constant 0 : i32
    %c0_i32_1 = arith.constant 0 : i32
    return %c0_i32, %c0_i32_0 : i32, i32
  }
  func.func @transform_3(%arg0: i32) -> (i32, i32) {
    %c0_i32 = arith.constant 0 : i32
    %c0_i32_0 = arith.constant 0 : i32
    %c0_i32_1 = arith.constant 0 : i32
    return %c0_i32, %c0_i32_0 : i32, i32
  }
  func.func @transform_4(%arg0: i32) -> (i32, i32) {
    %c0_i32 = arith.constant 0 : i32
    %c0_i32_0 = arith.constant 0 : i32
    %c0_i32_1 = arith.constant 0 : i32
    return %c0_i32, %c0_i32_0 : i32, i32
  }
  func.func @transform_5(%arg0: i32) -> (i32, i32) {
    %c0_i32 = arith.constant 0 : i32
    %c0_i32_0 = arith.constant 0 : i32
    %c0_i32_1 = arith.constant 0 : i32
    return %c0_i32, %c0_i32_0 : i32, i32
  }
  func.func @transform_6(%arg0: i32) -> (i32, i32) {
    %c0_i32 = arith.constant 0 : i32
    %c0_i32_0 = arith.constant 0 : i32
    %c0_i32_1 = arith.constant 0 : i32
    return %c0_i32, %c0_i32_0 : i32, i32
  }
  func.func @transform_7(%arg0: i32) -> (i32, i32) {
    %c0_i32 = arith.constant 0 : i32
    %c0_i32_0 = arith.constant 0 : i32
    return %c0_i32, %arg0 : i32, i32
  }
}

</mosaic_0001>

<bundles_post_ra>
// kernel: tpu_custom_call.1
= control target key start
LH: loop header
LB: loop body
LE: loop exit
PB: predicated region body
PF: predicated region fallthrough
CT: control target
= control target key end

     0   :  { %v1236_v2 = vmov 0   ;;  %s1959_s0 = inlined_call_operand.vmem [shape: f32[1,128], index: 0, kind: input, shape index: {}]   ;;  %s1960_s1 = inlined_call_operand.vmem [shape: f32[32,1], index: 1, kind: input, shape index: {}]   ;;  %s1961_s2 = inlined_call_operand.vmem [shape: f32[32,1], index: 2, kind: input, shape index: {}]   ;;  %s1962_s3 = inlined_call_operand.vmem [shape: f32[32,32], index: 3, kind: input, shape index: {}]   ;;  %s1963_s4 = inlined_call_operand.vmem [shape: f32[32,1], index: 4, kind: input, shape index: {}]   ;;  %s1964_s5 = inlined_call_operand.vmem [shape: f32[4,32], index: 5, kind: input, shape index: {}]   ;;  %s1965_s6 = inlined_call_operand.vmem [shape: f32[4,1], index: 6, kind: input, shape index: {}]   ;;  %s1966_s7 = inlined_call_operand.hbm [shape: f32[4,128], index: 7, kind: output, shape index: {}]  }
   0x1   :  { %v35_v0 = vld [vmem:[%s1961_s2 + $0x10] sm:$0xff]  ;;  %1181 = vset.pattern.permute.xlu1 %v1236_v2  ;;  %1180 = vset.pattern.permute.xlu0 %v1236_v2  ;;  %v36_v3 = vld [vmem:[%s1961_s2 + $0x18] sm:$0xff] }
   0x2   :  { %v31_v1 = vld [vmem:[%s1960_s1 + $0x10] sm:$0xff]  ;;  %79 = vperm.xlu1 %1181, %v35_v0   ;;  %v32_v4 = vld [vmem:[%s1960_s1 + $0x18] sm:$0xff] }
   0x3   :  { %49 = vperm.xlu0 %1180, %v31_v1  }
   0x4   :  { %12 = vsyncpa [#allocation3], 0  ;;  %v30_v5 = vld [vmem:[%s1960_s1 + $0x8] sm:$0xff]  ;;  %v29_v6 = vld [vmem:[%s1960_s1] sm:$0xff]  ;;  %v1237_v48 = vmov 920167782  }
   0x5   :  { %v34_v7 = vld [vmem:[%s1961_s2 + $0x8] sm:$0xff]  ;;  %v33_v8 = vld [vmem:[%s1961_s2] sm:$0xff]  ;;  %v514_v9 = vld [vmem:[%s1963_s4 + $0x18] sm:$0xff]  ;;  %v1238_v56 = vmov 2102212464   ;;  %s1245_s10 = smov [#allocation2]  }
   0x6   :  { %84 = vperm.xlu1 %1181, %v36_v3   ;;  %v513_v10 = vld [vmem:[%s1963_s4 + $0x10] sm:$0xff]  ;;  %v512_v11 = vld [vmem:[%s1963_s4 + $0x8] sm:$0xff]  ;;  %v511_v12 = vld [vmem:[%s1963_s4] sm:$0xff]  ;;  %v1239_v58 = vmov 1326507024   ;;  %s1071_s11 = sshll.u32 %s1245_s10, 4  ;;  %s1072_s11 = int_to_ptr.vmem [resolvable:$true] %s1071_s11 }
   0x7   :  { %54 = vperm.xlu0 %1180, %v32_v4   ;;  %v1012_v13 = vld [vmem:[%s1965_s6] sm:$0xf]  ;;  %s1214_s12 = scalar_lea.vmem %s1072_s11, 64  ;;  %p1219_p1 = scmp.lt.s32.totalorder %s1072_s11, %s1072_s11 }
   0x8   :  { %v1079_v14 = vld [vmem:[%s1959_s0] ss:$0 sm:$0xff]  ;;  %p1215_p0 = scmp.ne.s32.totalorder %s1072_s11, %s1214_s12  ;;  %p1220_p2 = scmp.lt.s32.totalorder %s1214_s12, %s1214_s12 }
   0xa   :  { %44 = vperm.xlu1 %1181, %v30_v5   ;;  %p1221_p3 = por %p1220_p2, %p1219_p1 }
   0xb   :  { %39 = vperm.xlu0 %1180, %v29_v6  }
   0xc   :  { %p1222_p4 = pnand %p1221_p3, %p1215_p0 }
   0xe   :  { %74 = vperm.xlu1 %1181, %v34_v7  }
   0xf   :  { %69 = vperm.xlu0 %1180, %v33_v8  }
  0x12   :  { %536 = vperm.xlu1 %1181, %v514_v9  }
  0x13   :  { %531 = vperm.xlu0 %1180, %v513_v10  }
  0x16   :  { %526 = vperm.xlu1 %1181, %v512_v11  }
  0x17   :  { %521 = vperm.xlu0 %1180, %v511_v12  }
  0x1b   :  { %1018 = vperm.xlu0 %1180, %v1012_v13  }
  0x7d   :  { %v80_v15 = vpop.permute.xlu1 %79 }
  0x7e   :  { %v50_v16 = vpop.permute.xlu0 %49 }
  0x7f   :  { %v65_v17 = vmul.f32 %v1079_v14, %v50_v16 }
  0x81   :  { %v1328_v18 = vadd.f32 %v80_v15, %v65_v17  ;;  %v85_v19 = vpop.permute.xlu1 %84 }
  0x82   :  { %v55_v20 = vpop.permute.xlu0 %54 }
  0x83   :  { %v302_v21 = vand.u32 2139095040, %v1328_v18  ;;  %v66_v22 = vmul.f32 %v1079_v14, %v55_v20  ;;  %v299_v29 = vand.u32 2147483647, %v1328_v18  ;;  %v1240_v20 = vmov 683565275  }
  0x85   :  { %v303_v23 = vshrl.u32 %v302_v21, 23  ;;  %v1331_v24 = vadd.f32 %v85_v19, %v66_v22  ;;  %v45_v25 = vpop.permute.xlu1 %44  ;;  %v306_v42 = vand.u32 8388607, %v299_v29  ;;  %v1241_v22 = vmov 2475754826  }
  0x86   :  { %v40_v26 = vpop.permute.xlu0 %39  ;;  %v64_v32 = vmul.f32 %v1079_v14, %v45_v25 }
  0x87   :  { %v1088_v27 = vadd.s32 4294967169, %v303_v23  ;;  %v406_v28 = vand.u32 2139095040, %v1331_v24  ;;  %v63_v33 = vmul.f32 %v1079_v14, %v40_v26  ;;  %v307_v51 = vor.u32 8388608, %v306_v42 }
  0x88   :  { %v403_v55 = vand.u32 2147483647, %v1331_v24 }
  0x89   :  { %v309_v30 = vadd.s32 1, %v1088_v27  ;;  %v407_v31 = vshrl.u32 %v406_v28, 23  ;;  %v75_v34 = vpop.permute.xlu1 %74  ;;  %v1373_v2 = vshll.u32 %v307_v51, 8 }
  0x8a   :  { %v70_v35 = vpop.permute.xlu0 %69  ;;  %v1335_v37 = vadd.f32 %v75_v34, %v64_v32  ;;  %v1377_v6 = vand.u32 8388607, %v403_v55 }
  0x8b   :  { %vm310_vm0 = vcmp.gt.s32.totalorder %v309_v30, 0  ;;  %v1092_v36 = vadd.s32 4294967169, %v407_v31  ;;  %v1337_v38 = vadd.f32 %v70_v35, %v63_v33 }
  0x8c   :  { %v311_v39 = vsel %vm310_vm0, %v309_v30, 0  ;;  %v195_v43 = vand.u32 2147483647, %v1335_v37  ;;  %v198_v44 = vand.u32 2139095040, %v1335_v37  ;;  %v1242_v30 = vmov 2131351028  }
  0x8d   :  { %v1339_v40 = vand.u32 31, %v311_v39  ;;  %v413_v41 = vadd.s32 1, %v1092_v36  ;;  %v91_v46 = vand.u32 2147483647, %v1337_v38  ;;  %v1351_v52 = vshrl.u32 %v311_v39, 5 }
  0x8e   :  { %v199_v47 = vshrl.u32 %v198_v44, 23  ;;  %v202_v54 = vand.u32 8388607, %v195_v43  ;;  %v94_v60 = vand.u32 2139095040, %v1337_v38 }
  0x8f   :  { %v1346_v45 = vsub.s32 32, %v1339_v40  ;;  %vm414_vm1 = vcmp.gt.s32.totalorder %v413_v41, 0  ;;  %v325_v57 = vshll.u32 %v1238_v56, %v1339_v40  ;;  %v98_v61 = vand.u32 8388607, %v91_v46 }
  0x90   :  { %v415_v50 = vsel %vm414_vm1, %v413_v41, 0  ;;  %v1084_v53 = vadd.s32 4294967169, %v199_v47  ;;  %v1371_v0 = vshll.u32 %v1237_v48, %v1339_v40  ;;  %v203_v3 = vor.u32 8388608, %v202_v54 }
  0x91   :  { %v326_v49 = vshrl.u32 %v1237_v48, %v1346_v45  ;;  %v1360_v59 = vshrl.u32 %v1239_v58, %v1346_v45  ;;  %v1365_v62 = vand.u32 31, %v415_v50  ;;  %v95_v4 = vshrl.u32 %v94_v60, 23 }
  0x92   :  { %v205_v1 = vadd.s32 1, %v1084_v53  ;;  %v99_v5 = vor.u32 8388608, %v98_v61  ;;  %vm334_vm2 = vcmp.lt.s32.totalorder %v1351_v52, 4  ;;  %v1382_v8 = vshrl.u32 %v415_v50, 5 }
  0x93   :  { %v1367_v63 = vor.u32 %v326_v49, %v325_v57  ;;  %v330_v7 = vor.u32 %v1360_v59, %v1371_v0  ;;  %v1385_v9 = vsub.s32 32, %v1365_v62  ;;  %v1389_v10 = vshll.u32 %v1238_v56, %v1365_v62 }
  0x94   :  { %vm206_vm3 = vcmp.gt.s32.totalorder %v205_v1, 0  ;;  %v1080_v12 = vadd.s32 4294967169, %v95_v4  ;;  %v1398_v14 = vshll.u32 %v1237_v48, %v1365_v62  ;;  %v1400_v17 = vshll.u32 %v203_v3, 8 }
  0x95   :  { %v207_v11 = vsel %vm206_vm3, %v205_v1, 0  ;;  %v1394_v13 = vsel %vm334_vm2, %v1367_v63, 920167782  ;;  %v1402_v19 = vshll.u32 %v99_v5, 8  ;;  %v316_v21 = vshll.u32 %v1240_v20, %v1339_v40 }
  0x96   :  { %v208_v15 = vshrl.u32 %v207_v11, 5  ;;  %v209_v16 = vand.u32 31, %v207_v11  ;;  %v317_v23 = vshrl.u32 %v1241_v22, %v1346_v45  ;;  %v101_v28 = vadd.s32 1, %v1080_v12 }
  0x97   :  { %vm331_vm14 = vcmp.lt.s32.totalorder %v1351_v52, 1  ;;  %vm332_vm15 = vcmp.lt.s32.totalorder %v1351_v52, 2  ;;  %vm333_vm0 = vcmp.lt.s32.totalorder %v1351_v52, 3  ;;  %v423_v52 = vshll.u32 %v1241_v22, %v1365_v62 }
  0x98   :  { %v210_v25 = vsub.s32 32, %v209_v16  ;;  %v212_v26 = vshll.u32 %v1240_v20, %v209_v16  ;;  %v215_v27 = vshll.u32 %v1241_v22, %v209_v16  ;;  %v218_v31 = vshll.u32 %v1242_v30, %v209_v16 }
  0x99   :  { %v221_v32 = vshll.u32 %v1238_v56, %v209_v16  ;;  %v224_v33 = vshll.u32 %v1237_v48, %v209_v16  ;;  %vm227_vm4 = vcmp.lt.s32.totalorder %v208_v15, 1  ;;  %vm228_vm5 = vcmp.lt.s32.totalorder %v208_v15, 2 }
  0x9a   :  { %v213_v34 = vshrl.u32 %v1241_v22, %v210_v25  ;;  %v216_v35 = vshrl.u32 %v1242_v30, %v210_v25  ;;  %v219_v36 = vshrl.u32 %v1238_v56, %v210_v25  ;;  %v211_v39 = vshrl.u32 %v1240_v20, %v210_v25 }
  0x9b   :  { %v222_v41 = vshrl.u32 %v1237_v48, %v210_v25  ;;  %v225_v42 = vshrl.u32 %v1239_v58, %v210_v25  ;;  %vm229_vm6 = vcmp.lt.s32.totalorder %v208_v15, 3  ;;  %vm102_vm7 = vcmp.gt.s32.totalorder %v101_v28, 0 }
  0x9c   :  { %v214_v44 = vor.u32 %v213_v34, %v212_v26  ;;  %v217_v47 = vor.u32 %v216_v35, %v215_v27  ;;  %v220_v49 = vor.u32 %v219_v36, %v218_v31  ;;  %vm230_vm8 = vcmp.lt.s32.totalorder %v208_v15, 4 }
  0x9d   :  { %v223_v50 = vor.u32 %v222_v41, %v221_v32  ;;  %v226_v51 = vor.u32 %v225_v42, %v224_v33  ;;  %v103_v53 = vsel %vm102_vm7, %v101_v28, 0  ;;  %v1428_v28 = vor.u32 %v317_v23, %v316_v21 }
  0x9e   :  { %v231_v54 = vsel %vm227_vm4, %v211_v39, %v214_v44  ;;  %v232_v57 = vsel %vm230_vm8, %v220_v49, 2102212464  ;;  %v235_v60 = vsel %vm227_vm4, %v214_v44, %v217_v47  ;;  %v239_v61 = vsel %vm227_vm4, %v217_v47, %v220_v49 }
  0x9f   :  { %v233_v1 = vsel %vm229_vm6, %v217_v47, %v232_v57  ;;  %v236_v3 = vsel %vm230_vm8, %v223_v50, 920167782  ;;  %v240_v4 = vsel %vm230_vm8, %v226_v51, 1326507024  ;;  %v104_v5 = vshrl.u32 %v103_v53, 5 }
  0xa0   :  { %v234_v11 = vsel %vm228_vm5, %v231_v54, %v233_v1  ;;  %v237_v12 = vsel %vm229_vm6, %v220_v49, %v236_v3  ;;  %v241_v16 = vsel %vm229_vm6, %v223_v50, %v240_v4  ;;  %v105_v25 = vand.u32 31, %v103_v53 }
  0xa1   :  { %v238_v26 = vsel %vm228_vm5, %v235_v60, %v237_v12  ;;  %v242_v27 = vsel %vm228_vm5, %v239_v61, %v241_v16  ;;  %v319_v31 = vshll.u32 %v1241_v22, %v1339_v40  ;;  %v250_v36 = vmul.u32 %v1400_v17, %v234_v11 }
  0xa2   :  { %v1433_v32 = vmul.u32.u64.low %v1400_v17, %v242_v27  ;;  %v1434_v33 = vmul.u32.u64.high %v1400_v17, %v242_v27, %v1433_v32  ;;  %v1437_v34 = vmul.u32.u64.low %v1400_v17, %v238_v26  ;;  %v1438_v35 = vmul.u32.u64.high %v1400_v17, %v238_v26, %v1437_v34 }
  0xa3   :  { %v106_v39 = vsub.s32 32, %v105_v25  ;;  %vm123_vm9 = vcmp.lt.s32.totalorder %v104_v5, 1  ;;  %v320_v15 = vshrl.u32 %v1242_v30, %v1346_v45  ;;  %v108_v21 = vshll.u32 %v1240_v20, %v105_v25 }
  0xa4   :  { %v111_v23 = vshll.u32 %v1241_v22, %v105_v25  ;;  %v114_v41 = vshll.u32 %v1242_v30, %v105_v25  ;;  %v117_v42 = vshll.u32 %v1238_v56, %v105_v25  ;;  %v120_v17 = vshll.u32 %v1237_v48, %v105_v25 }
  0xa5   :  { %v109_v44 = vshrl.u32 %v1241_v22, %v106_v39  ;;  %v112_v47 = vshrl.u32 %v1242_v30, %v106_v39  ;;  %v115_v49 = vshrl.u32 %v1238_v56, %v106_v39  ;;  %vm252_vm10 = vc.u32 %v1434_v33, %v1437_v34 }
  0xa6   :  { %v253_v50 = vadd.s32 1, %v1438_v35  ;;  %v107_v51 = vshrl.u32 %v1240_v20, %v106_v39  ;;  %v118_v53 = vshrl.u32 %v1237_v48, %v106_v39  ;;  %v121_v61 = vshrl.u32 %v1239_v58, %v106_v39 }
  0xa7   :  { %v110_v54 = vor.u32 %v109_v44, %v108_v21  ;;  %v113_v57 = vor.u32 %v112_v47, %v111_v23  ;;  %v116_v60 = vor.u32 %v115_v49, %v114_v41  ;;  %vm125_vm11 = vcmp.lt.s32.totalorder %v104_v5, 3 }
  0xa8   :  { %v254_v1 = vsel %vm252_vm10, %v253_v50, %v1438_v35  ;;  %v119_v3 = vor.u32 %v118_v53, %v117_v42  ;;  %vm126_vm12 = vcmp.lt.s32.totalorder %v104_v5, 4  ;;  %v122_v11 = vor.u32 %v121_v61, %v120_v17 }
  0xa9   :  { %v255_v4 = vadd.s32 %v254_v1, %v250_v36  ;;  %v127_v12 = vsel %vm123_vm9, %v107_v51, %v110_v54  ;;  %v128_v16 = vsel %vm126_vm12, %v116_v60, 2102212464  ;;  %v131_v26 = vsel %vm123_vm9, %v110_v54, %v113_v57 }
  0xaa   :  { %v129_v25 = vsel %vm125_vm11, %v113_v57, %v128_v16  ;;  %v132_v27 = vsel %vm126_vm12, %v119_v3, 920167782  ;;  %v135_v32 = vsel %vm123_vm9, %v113_v57, %v116_v60  ;;  %vm124_vm13 = vcmp.lt.s32.totalorder %v104_v5, 2 }
  0xab   :  { %v256_v21 = vadd.s32 536870912, %v255_v4  ;;  %v133_v39 = vsel %vm125_vm11, %v116_v60, %v132_v27  ;;  %v136_v35 = vsel %vm126_vm12, %v122_v11, 1326507024  ;;  %v130_v23 = vsel %vm124_vm13, %v127_v12, %v129_v25 }
  0xac   :  { %v134_v41 = vsel %vm124_vm13, %v131_v26, %v133_v39  ;;  %v137_v36 = vsel %vm125_vm11, %v119_v3, %v136_v35  ;;  %v321_v42 = vor.u32 %v320_v15, %v319_v31  ;;  %v322_v53 = vshll.u32 %v1242_v30, %v1339_v40 }
  0xad   :  { %v1465_v44 = vshrl.u32 %v256_v21, 30  ;;  %v138_v47 = vsel %vm124_vm13, %v135_v32, %v137_v36  ;;  %v1468_v49 = vmul.u32.u64.low %v1402_v19, %v134_v41  ;;  %v1469_v17 = vmul.u32.u64.high %v1402_v19, %v134_v41, %v1468_v49 }
  0xae   :  { %v1473_v50 = vmul.u32.u64.low %v1402_v19, %v138_v47  ;;  %v1474_v51 = vmul.u32.u64.high %v1402_v19, %v138_v47, %v1473_v50  ;;  %v323_v5 = vshrl.u32 %v1238_v56, %v1346_v45  ;;  %v344_v31 = vsel %vm334_vm2, %v330_v7, 1326507024 }
  0xaf   :  { %v430_v15 = vshrl.u32 %v1237_v48, %v1385_v9  ;;  %v258_v54 = vshll.u32 %v1465_v44, 30  ;;  %v146_v57 = vmul.u32 %v1402_v19, %v130_v23  ;;  %v315_v40 = vshrl.u32 %v1240_v20, %v1346_v45 }
  0xb0   :  { %v324_v60 = vor.u32 %v323_v5, %v322_v53  ;;  %v339_v59 = vsel %vm331_vm14, %v1428_v28, %v321_v42  ;;  %v149_v7 = vadd.s32 1, %v1469_v17  ;;  %vm148_vm1 = vc.u32 %v1474_v51, %v1468_v49 }
  0xb1   :  { %v1495_v0 = vsub.s32 %v255_v4, %v258_v54  ;;  %v345_v61 = vsel %vm333_vm0, %v1367_v63, %v344_v31  ;;  %v433_v1 = vshrl.u32 %v1239_v58, %v1385_v9  ;;  %v335_v16 = vsel %vm331_vm14, %v315_v40, %v1428_v28 }
  0xb2   :  { %v336_v19 = vsel %vm334_vm2, %v324_v60, 2102212464  ;;  %v341_v45 = vsel %vm333_vm0, %v324_v60, %v1394_v13  ;;  %v150_v4 = vsel %vm148_vm1, %v149_v7, %v1469_v17  ;;  %v343_v13 = vsel %vm331_vm14, %v321_v42, %v324_v60 }
  0xb3   :  { %v261_v3 = vsub.s32 0, %v1495_v0  ;;  %v342_v11 = vsel %vm332_vm15, %v339_v59, %v341_v45  ;;  %v151_v12 = vadd.s32 %v150_v4, %v146_v57  ;;  %v337_v25 = vsel %vm333_vm0, %v321_v42, %v336_v19 }
  0xb4   :  { %v346_v26 = vsel %vm332_vm15, %v343_v13, %v345_v61  ;;  %v1521_v27 = vmul.u32.u64.low %v1373_v2, %v342_v11  ;;  %v1522_v32 = vmul.u32.u64.high %v1373_v2, %v342_v11, %v1521_v27  ;;  %v421_v28 = vshrl.u32 %v1241_v22, %v1385_v9 }
  0xb5   :  { %v1085_v63 = vmin.u32 %v261_v3, %v1495_v0  ;;  %v152_v21 = vadd.s32 536870912, %v151_v12  ;;  %v1526_v39 = vmul.u32.u64.low %v1373_v2, %v346_v26  ;;  %v1527_v35 = vmul.u32.u64.high %v1373_v2, %v346_v26, %v1526_v39 }
  0xb6   :  { %vm438_vm2 = vcmp.lt.s32.totalorder %v1382_v8, 4  ;;  %v338_v41 = vsel %vm332_vm15, %v335_v16, %v337_v25  ;;  %v424_v36 = vshrl.u32 %v1242_v30, %v1385_v9  ;;  %v431_v42 = vor.u32 %v430_v15, %v1389_v10 }
  0xb7   :  { %v263_v23 = vclz %v1085_v63  ;;  %v1537_v47 = vshrl.u32 %v152_v21, 30  ;;  %v420_v17 = vshll.u32 %v1240_v20, %v1365_v62  ;;  %v427_v50 = vshrl.u32 %v1238_v56, %v1385_v9 }
  0xb8   :  { %v434_v53 = vor.u32 %v433_v1, %v1398_v14  ;;  %v357_v5 = vadd.s32 1, %v1522_v32  ;;  %v426_v31 = vshll.u32 %v1242_v30, %v1365_v62  ;;  %v354_v15 = vmul.u32 %v1373_v2, %v338_v41 }
  0xb9   :  { %v154_v10 = vshll.u32 %v1537_v47, 30  ;;  %vm356_vm3 = vc.u32 %v1527_v35, %v1521_v27  ;;  %v422_v54 = vor.u32 %v421_v28, %v420_v17  ;;  %v1086_v57 = vadd.s32 4294967294, %v263_v23 }
  0xba   :  { %v358_v40 = vsel %vm356_vm3, %v357_v5, %v1522_v32  ;;  %v425_v14 = vor.u32 %v424_v36, %v423_v52  ;;  %v428_v60 = vor.u32 %v427_v50, %v426_v31  ;;  %v444_v59 = vsel %vm438_vm2, %v431_v42, 920167782 }
  0xbb   :  { %v1556_v7 = vsub.s32 %v151_v12, %v154_v10  ;;  %v359_v19 = vadd.s32 %v358_v40, %v354_v15  ;;  %v448_v62 = vsel %vm438_vm2, %v434_v53, 1326507024  ;;  %v411_v2 = vor.u32 8388608, %v1377_v6 }
  0xbc   :  { %vm435_vm4 = vcmp.lt.s32.totalorder %v1382_v8, 1  ;;  %vm437_vm5 = vcmp.lt.s32.totalorder %v1382_v8, 3  ;;  %vm1087_vm6 = vcmp.lt.s32.totalorder %v1086_v57, 0  ;;  %vm436_vm7 = vcmp.lt.s32.totalorder %v1382_v8, 2 }
  0xbd   :  { %v157_v45 = vsub.s32 0, %v1556_v7  ;;  %v360_v61 = vadd.s32 536870912, %v359_v19  ;;  %v443_v1 = vsel %vm435_vm4, %v422_v54, %v425_v14  ;;  %v445_v3 = vsel %vm437_vm5, %v428_v60, %v444_v59 }
  0xbe   :  { %v447_v4 = vsel %vm435_vm4, %v425_v14, %v428_v60  ;;  %v449_v12 = vsel %vm437_vm5, %v431_v42, %v448_v62  ;;  %v451_v25 = vshll.u32 %v411_v2, 8  ;;  %v266_v13 = vsel %vm1087_vm6, 0, %v1086_v57 }
  0xbf   :  { %v1081_v11 = vmin.u32 %v157_v45, %v1556_v7  ;;  %v1571_v6 = vshrl.u32 %v360_v61, 30  ;;  %v450_v16 = vsel %vm436_vm7, %v447_v4, %v449_v12  ;;  %v446_v32 = vsel %vm436_vm7, %v443_v1, %v445_v3 }
  0xc0   :  { %v1581_v21 = vmul.u32.u64.low %v451_v25, %v450_v16  ;;  %v1582_v39 = vmul.u32.u64.high %v451_v25, %v450_v16, %v1581_v21  ;;  %v440_v41 = vsel %vm438_vm2, %v428_v60, 2102212464  ;;  %v271_v36 = vsub.s32 4294967266, %v266_v13 }
  0xc1   :  { %v159_v63 = vclz %v1081_v11  ;;  %v362_v26 = vshll.u32 %v1571_v6, 30  ;;  %v419_v42 = vshrl.u32 %v1240_v20, %v1385_v9  ;;  %v441_v31 = vsel %vm437_vm5, %v425_v14, %v440_v41 }
  0xc2   :  { %v1588_v17 = vmul.u32.u64.low %v451_v25, %v446_v32  ;;  %v1589_v50 = vmul.u32.u64.high %v451_v25, %v446_v32, %v1588_v17  ;;  %v267_v57 = vsub.s32 32, %v266_v13  ;;  %v272_v40 = vadd.s32 127, %v271_v36 }
  0xc3   :  { %v1082_v28 = vadd.s32 4294967294, %v159_v63  ;;  %v363_v23 = vsub.s32 %v359_v19, %v362_v26  ;;  %v439_v52 = vsel %vm435_vm4, %v419_v42, %v422_v54  ;;  %v251_v54 = vadd.s32 %v1437_v34, %v1434_v33  ;;  %v507_v33 = vld [vmem:[%s1962_s3] sm:$0xff]  ;;  %v508_v34 = vld [vmem:[%s1962_s3 + $0x8] sm:$0xff] }
  0xc4   :  { %v461_v60 = vadd.s32 1, %v1589_v50  ;;  %v442_v19 = vsel %vm436_vm7, %v439_v52, %v441_v31  ;;  %vm460_vm9 = vc.u32 %v1582_v39, %v1588_v17  ;;  %v273_v2 = vshll.u32 %v272_v40, 23 }
  0xc5   :  { %vm1083_vm8 = vcmp.lt.s32.totalorder %v1082_v28, 0  ;;  %v365_v53 = vsub.s32 0, %v363_v23  ;;  %v458_v45 = vmul.u32 %v451_v25, %v442_v19  ;;  %v269_v1 = vshrl.u32 %v251_v54, %v267_v57 }
  0xc6   :  { %v162_v5 = vsel %vm1083_vm8, 0, %v1082_v28  ;;  %v462_v61 = vsel %vm460_vm9, %v461_v60, %v1589_v50  ;;  %v147_v4 = vadd.s32 %v1468_v49, %v1474_v51  ;;  %v268_v12 = vshll.u32 %v1495_v0, %v266_v13 }
  0xc7   :  { %v167_v10 = vsub.s32 4294967266, %v162_v5  ;;  %v1089_v15 = vmin.u32 %v365_v53, %v363_v23  ;;  %v163_v14 = vsub.s32 32, %v162_v5  ;;  %v463_v11 = vadd.s32 %v462_v61, %v458_v45 }
  0xc8   :  { %v274_v25 = vor.u32 4788187, %v273_v2  ;;  %v355_v32 = vadd.s32 %v1521_v27, %v1527_v35  ;;  %v270_v51 = vor.u32 %v269_v1, %v268_v12  ;;  %v164_v21 = vshll.u32 %v1556_v7, %v162_v5 }
  0xc9   :  { %v168_v9 = vadd.s32 127, %v167_v10  ;;  %v367_v59 = vclz %v1089_v15  ;;  %v165_v26 = vshrl.u32 %v147_v4, %v163_v14  ;;  %v464_v49 = vadd.s32 536870912, %v463_v11 }
  0xca   :  { %v515_v36 = vpack.c.bf16 %v508_v34, %v507_v33  ;;  %vm539_vm11 = vcmask 261120   ;;  %v275_v50 = vand.u32 2147483647, %v274_v25  ;;  %v277_v35 = vcvt.s32.f32 %v270_v51 }
  0xcb   :  { %v1090_v62 = vadd.s32 4294967294, %v367_v59  ;;  %v169_v3 = vshll.u32 %v168_v9, 23  ;;  %v1616_v41 = vshrl.u32 %v464_v49, 30  ;;  %v166_v53 = vor.u32 %v165_v26, %v164_v21 }
  0xcc   :  { %1126 = vmatprep.mubr.msk.bf16.mxu0 %vm539_vm11, %v515_v36  ;;  %v278_v5 = vmul.f32 %v277_v35, %v275_v50  ;;  %vm197_vm12 = vcmp.lt.s32.totalorder %v1335_v37, 0  ;;  %vm1625_vm14 = vcmp.le.f32.partialorder %v195_v43, 0.7853982  ;;  %vm93_vm15 = vcmp.lt.s32.totalorder %v1337_v38, 0 }
  0xcd   :  { %vm1091_vm10 = vcmp.lt.s32.totalorder %v1090_v62, 0  ;;  %v170_v0 = vor.u32 4788187, %v169_v3  ;;  %v466_v31 = vshll.u32 %v1616_v41, 30  ;;  %v173_v57 = vcvt.s32.f32 %v166_v53 }
  0xce   :  { %v370_v8 = vsel %vm1091_vm10, 0, %v1090_v62  ;;  %v279_v54 = vxor.u32 2147483648, %v278_v5  ;;  %vm1639_vm0 = vcmp.le.f32.partialorder %v91_v46, 0.7853982  ;;  %vm301_vm1 = vcmp.lt.s32.totalorder %v1328_v18, 0 }
  0xcf   :  { %v371_v16 = vsub.s32 32, %v370_v8  ;;  %v375_v63 = vsub.s32 4294967266, %v370_v8  ;;  %v372_v52 = vshll.u32 %v363_v23, %v370_v8  ;;  %v171_v10 = vand.u32 2147483647, %v170_v0 }
  0xd0   :  { %v467_v7 = vsub.s32 %v463_v11, %v466_v31  ;;  %v280_v45 = vsel %vm197_vm12, %v279_v54, %v278_v5  ;;  %v459_v8 = vadd.s32 %v1588_v17, %v1582_v39  ;;  %vm1651_vm2 = vcmp.le.f32.partialorder %v299_v29, 0.7853982 }
  0xd1   :  { %v376_v13 = vadd.s32 127, %v375_v63  ;;  %v373_v28 = vshrl.u32 %v355_v32, %v371_v16  ;;  %v174_v9 = vmul.f32 %v173_v57, %v171_v10  ;;  %v283_v16 = vsel %vm1625_vm14, %v1335_v37, %v280_v45 }
  0xd2   :  { %v469_v60 = vsub.s32 0, %v467_v7  ;;  %1182 = vcosq.f32 %v283_v16  ;;  %v177_v51 = vsub.s32 4, %v1537_v47  ;;  %v281_v29 = vsub.s32 4, %v1465_v44 }
  0xd3   :  { %v377_v42 = vshll.u32 %v376_v13, 23  ;;  %v374_v15 = vor.u32 %v373_v28, %v372_v52  ;;  %v175_v23 = vxor.u32 2147483648, %v174_v9  ;;  %1184 = vsinq.f32 %v283_v16 }
  0xd4   :  { %v1093_v19 = vmin.u32 %v469_v60, %v467_v7  ;;  %v385_v13 = vsub.s32 4, %v1571_v6  ;;  %v178_v36 = vsel %vm93_vm15, %v177_v51, %v1537_v47  ;;  %v489_v50 = vsub.s32 4, %v1616_v41 }
  0xd5   :  { %v378_v27 = vor.u32 4788187, %v377_v42  ;;  %v381_v59 = vcvt.s32.f32 %v374_v15  ;;  %v176_v4 = vsel %vm93_vm15, %v175_v23, %v174_v9  ;;  %v282_v53 = vsel %vm197_vm12, %v281_v29, %v1465_v44 }
  0xd6   :  { %v471_v2 = vclz %v1093_v19  ;;  %v179_v17 = vsel %vm1639_vm0, %v1337_v38, %v176_v4  ;;  %vm405_vm3 = vcmp.lt.s32.totalorder %v1331_v24, 0  ;;  %v386_v52 = vsel %vm301_vm1, %v385_v13, %v1571_v6 }
  0xd7   :  { %v379_v40 = vand.u32 2147483647, %v378_v27  ;;  %1186 = vcosq.f32 %v179_v17  ;;  %vm1674_vm4 = vcmp.le.f32.partialorder %v403_v55, 0.7853982  ;;  %v180_v27 = vsel %vm1639_vm0, 0, %v178_v36 }
  0xd8   :  { %v1094_v14 = vadd.s32 4294967294, %v471_v2  ;;  %1188 = vsinq.f32 %v179_v17  ;;  %v284_v35 = vsel %vm1625_vm14, 0, %v282_v53  ;;  %v490_v10 = vsel %vm405_vm3, %v489_v50, %v1616_v41 }
  0xd9   :  { %v382_v62 = vmul.f32 %v381_v59, %v379_v40  ;;  %v388_v55 = vsel %vm1651_vm2, 0, %v386_v52  ;;  %v184_v15 = vadd.s32 3, %v180_v27  ;;  %v288_v5 = vadd.s32 3, %v284_v35 }
  0xda   :  { %vm1095_vm13 = vcmp.lt.s32.totalorder %v1094_v14, 0  ;;  %v492_v40 = vsel %vm1674_vm4, 0, %v490_v10  ;;  %v392_v9 = vadd.s32 3, %v388_v55  ;;  %vm183_vm0 = vweird.f32 %v1337_v38  ;;  %v509_v38 = vld [vmem:[%s1962_s3 + $0x10] sm:$0xff]  ;;  %v537_v10 = vpop.permute.xlu1 %536 }
  0xdb   :  { %v383_v61 = vxor.u32 2147483648, %v382_v62  ;;  %v474_v3 = vsel %vm1095_vm13, 0, %v1094_v14  ;;  %v185_v19 = vand.u32 3, %v184_v15  ;;  %v289_v41 = vand.u32 3, %v288_v5 }
  0xdc   :  { %v475_v11 = vsub.s32 32, %v474_v3  ;;  %v479_v12 = vsub.s32 4294967266, %v474_v3  ;;  %v476_v33 = vshll.u32 %v467_v7, %v474_v3 }
  0xdd   :  { %v384_v63 = vsel %vm301_vm1, %v383_v61, %v382_v62  ;;  %v496_v62 = vadd.s32 3, %v492_v40  ;;  %v393_v61 = vand.u32 3, %v392_v9  ;;  %vm187_vm5 = vcmp.eq.s32.totalorder %v185_v19, 0 }
  0xde   :  { %v477_v34 = vshrl.u32 %v459_v8, %v475_v11  ;;  %v480_v39 = vadd.s32 127, %v479_v12  ;;  %v387_v32 = vsel %vm1651_vm2, %v1328_v18, %v384_v63  ;;  %vm190_vm6 = vcmp.eq.s32.totalorder %v185_v19, 2 }
  0xdf   :  { %1190 = vcosq.f32 %v387_v32  ;;  %v1183_v6 = vpop.eup %1182  ;;  %v497_v4 = vand.u32 3, %v496_v62  ;;  %vm291_vm7 = vcmp.eq.s32.totalorder %v289_v41, 0  ;;  %vm294_vm8 = vcmp.eq.s32.totalorder %v289_v41, 2 }
  0xe0   :  { %v478_v25 = vor.u32 %v477_v34, %v476_v33  ;;  %v481_v26 = vshll.u32 %v480_v39, 23  ;;  %1192 = vsinq.f32 %v387_v32  ;;  %v1185_v7 = vpop.eup %1184  ;;  %v295_v45 = vxor.u32 2147483648, %v1183_v6 }
  0xe1   :  { %v292_v14 = vxor.u32 2147483648, %v1185_v7  ;;  %vm395_vm9 = vcmp.eq.s32.totalorder %v393_v61, 0  ;;  %vm398_vm10 = vcmp.eq.s32.totalorder %v393_v61, 2  ;;  %vm186_vm12 = vcmp.lt.s32.totalorder %v185_v19, 2 }
  0xe2   :  { %v482_v49 = vor.u32 4788187, %v481_v26  ;;  %v485_v0 = vcvt.s32.f32 %v478_v25  ;;  %v296_v16 = vsel %vm294_vm8, %v295_v45, %v1185_v7  ;;  %vm290_vm13 = vcmp.lt.s32.totalorder %v289_v41, 2 }
  0xe3   :  { %v293_v12 = vsel %vm291_vm7, %v1183_v6, %v292_v14  ;;  %vm394_vm14 = vcmp.lt.s32.totalorder %v393_v61, 2  ;;  %vm502_vm15 = vcmp.eq.s32.totalorder %v497_v4, 2  ;;  %vm499_vm1 = vcmp.eq.s32.totalorder %v497_v4, 0 }
  0xe4   :  { %v483_v21 = vand.u32 2147483647, %v482_v49  ;;  %v1187_v57 = vpop.eup %1186  ;;  %v297_v46 = vsel %vm290_vm13, %v293_v12, %v296_v16  ;;  %vm287_vm2 = vweird.f32 %v1335_v37  ;;  %v510_v37 = vld [vmem:[%s1962_s3 + $0x18] sm:$0xff] }
  0xe5   :  { %v1189_v60 = vpop.eup %1188  ;;  %v191_v23 = vxor.u32 2147483648, %v1187_v57 }
  0xe6   :  { %v486_v28 = vmul.f32 %v485_v0, %v483_v21  ;;  %v188_v2 = vxor.u32 2147483648, %v1189_v60  ;;  %v298_v21 = vsel %vm287_vm2, nan, %v297_v46 }
  0xe7   :  { %v192_v11 = vsel %vm190_vm6, %v191_v23, %v1189_v60 }
  0xe8   :  { %v487_v42 = vxor.u32 2147483648, %v486_v28  ;;  %v189_v8 = vsel %vm187_vm5, %v1187_v57, %v188_v2  ;;  %vm495_vm5 = vweird.f32 %v1331_v24 }
  0xe9   :  { %v193_v17 = vsel %vm186_vm12, %v189_v8, %v192_v11 }
  0xea   :  { %v488_v47 = vsel %vm405_vm3, %v487_v42, %v486_v28  ;;  %vm498_vm3 = vcmp.lt.s32.totalorder %v497_v4, 2  ;;  %v194_v51 = vsel %vm183_vm0, nan, %v193_v17  ;;  %v516_v42 = vpack.c.bf16 %v510_v37, %v509_v38 }
  0xeb   :  { %v491_v44 = vsel %vm1674_vm4, %v1331_v24, %v488_v47  ;;  %vm391_vm4 = vweird.f32 %v1328_v18  ;;  %v517_v36 = vpack.c.bf16 %v298_v21, %v194_v51  ;;  %v1243_v18 = vmov 0.0   ;;  %v532_v24 = vpop.permute.xlu0 %531 }
  0xec   :  { %1194 = vcosq.f32 %v491_v44  ;;  %v1191_v59 = vpop.eup %1190  ;;  %1130 = vmatprep.subr.bf16.mxu1 %v1243_v18 }
  0xed   :  { %1196 = vsinq.f32 %v491_v44  ;;  %v1193_v54 = vpop.eup %1192  ;;  %v399_v3 = vxor.u32 2147483648, %v1191_v59 }
  0xee   :  { %v396_v1 = vxor.u32 2147483648, %v1193_v54 }
  0xef   :  { %v400_v33 = vsel %vm398_vm10, %v399_v3, %v1193_v54  ;;  %v522_v52 = vpop.permute.xlu0 %521 }
  0xf0   :  { %v397_v63 = vsel %vm395_vm9, %v1191_v59, %v396_v1  ;;  %v527_v1 = vpop.permute.xlu1 %526 }
  0xf1   :  { %v401_v26 = vsel %vm394_vm14, %v397_v63, %v400_v33 }
  0xf2   :  { %v402_v29 = vsel %vm391_vm4, nan, %v401_v26 }
  0xf9   :  { %v1195_v43 = vpop.eup %1194 }
  0xfa   :  { %v1197_v34 = vpop.eup %1196  ;;  %v503_v39 = vxor.u32 2147483648, %v1195_v43 }
  0xfb   :  { %v500_v25 = vxor.u32 2147483648, %v1197_v34 }
  0xfc   :  { %v504_v32 = vsel %vm502_vm15, %v503_v39, %v1197_v34 }
  0xfd   :  { %v501_v49 = vsel %vm499_vm1, %v1195_v43, %v500_v25 }
  0xfe   :  { %v505_v0 = vsel %vm498_vm3, %v501_v49, %v504_v32 }
  0xff   :  { %v506_v13 = vsel %vm495_vm5, nan, %v505_v0 }
 0x100   :  { %v518_v28 = vpack.c.bf16 %v506_v13, %v402_v29 }
 0x102   :  { %1122 = vmatprep.subr.bf16.mxu0 %v518_v28 }
 0x103   :  { %1123 = vmatpush3.bf16.msra.mxu0 %v518_v28 }
 0x104   :  { %1124 = vmatprep.subr.bf16.mxu0 %v517_v36 }
 0x107   :  { %1125 = vmatpush3.bf16.msra.mxu0 %v517_v36 }
 0x10a   :  { %1127 = vmatmul.mubr.msk.bf16.vlgmr.msra.gmra.mxu0 %vm539_vm11, %v516_v42 }
 0x1ca   :  { %v1128_v50 = vpop.f32.mrf.mxu0 }
 0x1cb   :  { %v1702_v53 = vadd.f32 %v1128_v50, %v532_v24 }
 0x1cc   :  { %v580_v31 = vpop.f32.mrf.mxu0 }
 0x1cd   :  { %v803_v47 = vand.u32 2147483647, %v1702_v53  ;;  %v806_v27 = vand.u32 2139095040, %v1702_v53  ;;  %v1706_v44 = vadd.f32 %v580_v31, %v522_v52 }
 0x1ce   :  { %v1129_v35 = vpop.f32.mrf.mxu0 }
 0x1cf   :  { %v807_v6 = vshrl.u32 %v806_v27, 23  ;;  %v810_v55 = vand.u32 8388607, %v803_v47  ;;  %v595_v15 = vand.u32 2147483647, %v1706_v44  ;;  %v598_v7 = vand.u32 2139095040, %v1706_v44 }
 0x1d0   :  { %v1712_v5 = vadd.f32 %v1129_v35, %v537_v10  ;;  %v583_v23 = vpop.f32.mrf.mxu0 }
 0x1d1   :  { %v1106_v57 = vadd.s32 4294967169, %v807_v6  ;;  %v602_v40 = vand.u32 8388607, %v595_v15  ;;  %v599_v60 = vshrl.u32 %v598_v7, 23  ;;  %v811_v59 = vor.u32 8388608, %v810_v55 }
 0x1d2   :  { %v910_v9 = vand.u32 2139095040, %v1712_v5  ;;  %v907_v41 = vand.u32 2147483647, %v1712_v5  ;;  %v1726_v16 = vadd.f32 %v583_v23, %v527_v1 }
 0x1d3   :  { %v813_v19 = vadd.s32 1, %v1106_v57  ;;  %v1098_v54 = vadd.s32 4294967169, %v599_v60  ;;  %v603_v62 = vor.u32 8388608, %v602_v40  ;;  %v1718_v8 = vshll.u32 %v811_v59, 8 }
 0x1d4   :  { %v911_v2 = vshrl.u32 %v910_v9, 23  ;;  %v1724_v12 = vand.u32 8388607, %v907_v41 }
 0x1d5   :  { %vm814_vm6 = vcmp.gt.s32.totalorder %v813_v19, 0  ;;  %v605_v45 = vadd.s32 1, %v1098_v54  ;;  %v1720_v11 = vshll.u32 %v603_v62, 8 }
 0x1d6   :  { %v815_v14 = vsel %vm814_vm6, %v813_v19, 0  ;;  %v1110_v61 = vadd.s32 4294967169, %v911_v2 }
 0x1d7   :  { %v816_v3 = vshrl.u32 %v815_v14, 5  ;;  %v817_v4 = vand.u32 31, %v815_v14  ;;  %vm606_vm7 = vcmp.gt.s32.totalorder %v605_v45, 0 }
 0x1d8   :  { %v1730_v34 = vadd.s32 1, %v1110_v61  ;;  %v607_v28 = vsel %vm606_vm7, %v605_v45, 0 }
 0x1d9   :  { %v818_v43 = vsub.s32 32, %v817_v4  ;;  %v820_v63 = vshll.u32 %v1240_v20, %v817_v4  ;;  %v823_v33 = vshll.u32 %v1241_v22, %v817_v4  ;;  %v826_v39 = vshll.u32 %v1242_v30, %v817_v4 }
 0x1da   :  { %v829_v17 = vshll.u32 %v1238_v56, %v817_v4  ;;  %v832_v46 = vshll.u32 %v1237_v48, %v817_v4  ;;  %vm835_vm8 = vcmp.lt.s32.totalorder %v816_v3, 1  ;;  %vm836_vm9 = vcmp.lt.s32.totalorder %v816_v3, 2 }
 0x1db   :  { %v821_v25 = vshrl.u32 %v1241_v22, %v818_v43  ;;  %v824_v26 = vshrl.u32 %v1242_v30, %v818_v43  ;;  %v827_v32 = vshrl.u32 %v1238_v56, %v818_v43  ;;  %v819_v49 = vshrl.u32 %v1240_v20, %v818_v43 }
 0x1dc   :  { %v830_v51 = vshrl.u32 %v1237_v48, %v818_v43  ;;  %v833_v21 = vshrl.u32 %v1239_v58, %v818_v43  ;;  %vm837_vm10 = vcmp.lt.s32.totalorder %v816_v3, 3  ;;  %vm838_vm12 = vcmp.lt.s32.totalorder %v816_v3, 4 }
 0x1dd   :  { %v822_v0 = vor.u32 %v821_v25, %v820_v63  ;;  %v825_v29 = vor.u32 %v824_v26, %v823_v33  ;;  %v828_v13 = vor.u32 %v827_v32, %v826_v39  ;;  %v609_v37 = vand.u32 31, %v607_v28 }
 0x1de   :  { %v831_v36 = vor.u32 %v830_v51, %v829_v17  ;;  %v834_v38 = vor.u32 %v833_v21, %v832_v46  ;;  %v608_v57 = vshrl.u32 %v607_v28, 5  ;;  %vm918_vm2 = vcmp.gt.s32.totalorder %v1730_v34, 0 }
 0x1df   :  { %v839_v42 = vsel %vm835_vm8, %v819_v49, %v822_v0  ;;  %v840_v24 = vsel %vm838_vm12, %v828_v13, 2102212464  ;;  %v843_v50 = vsel %vm835_vm8, %v822_v0, %v825_v29  ;;  %v847_v52 = vsel %vm835_vm8, %v825_v29, %v828_v13 }
 0x1e0   :  { %v841_v31 = vsel %vm837_vm10, %v825_v29, %v840_v24  ;;  %v844_v27 = vsel %vm838_vm12, %v831_v36, 920167782  ;;  %v848_v35 = vsel %vm838_vm12, %v834_v38, 1326507024  ;;  %v610_v10 = vsub.s32 32, %v609_v37 }
 0x1e1   :  { %v842_v6 = vsel %vm836_vm9, %v839_v42, %v841_v31  ;;  %v845_v55 = vsel %vm837_vm10, %v828_v13, %v844_v27  ;;  %v849_v7 = vsel %vm837_vm10, %v831_v36, %v848_v35  ;;  %v612_v59 = vshll.u32 %v1240_v20, %v609_v37 }
 0x1e2   :  { %v846_v40 = vsel %vm836_vm9, %v843_v50, %v845_v55  ;;  %v850_v60 = vsel %vm836_vm9, %v847_v52, %v849_v7  ;;  %v858_v9 = vmul.u32 %v1718_v8, %v842_v6  ;;  %v611_v23 = vshrl.u32 %v1240_v20, %v610_v10 }
 0x1e3   :  { %v1754_v19 = vmul.u32.u64.low %v1718_v8, %v850_v60  ;;  %v1755_v54 = vmul.u32.u64.high %v1718_v8, %v850_v60, %v1754_v19  ;;  %v1758_v62 = vmul.u32.u64.low %v1718_v8, %v846_v40  ;;  %v1759_v2 = vmul.u32.u64.high %v1718_v8, %v846_v40, %v1758_v62 }
 0x1e4   :  { %v613_v14 = vshrl.u32 %v1241_v22, %v610_v10  ;;  %v615_v45 = vshll.u32 %v1241_v22, %v609_v37  ;;  %v616_v61 = vshrl.u32 %v1242_v30, %v610_v10  ;;  %v618_v1 = vshll.u32 %v1242_v30, %v609_v37 }
 0x1e5   :  { %v619_v3 = vshrl.u32 %v1238_v56, %v610_v10  ;;  %v621_v4 = vshll.u32 %v1238_v56, %v609_v37  ;;  %v622_v43 = vshrl.u32 %v1237_v48, %v610_v10  ;;  %v624_v33 = vshll.u32 %v1237_v48, %v609_v37 }
 0x1e6   :  { %v614_v63 = vor.u32 %v613_v14, %v612_v59  ;;  %v617_v8 = vor.u32 %v616_v61, %v615_v45  ;;  %v625_v39 = vshrl.u32 %v1239_v58, %v610_v10  ;;  %vm860_vm13 = vc.u32 %v1755_v54, %v1758_v62 }
 0x1e7   :  { %v861_v17 = vadd.s32 1, %v1759_v2  ;;  %v620_v46 = vor.u32 %v619_v3, %v618_v1  ;;  %vm627_vm14 = vcmp.lt.s32.totalorder %v608_v57, 1  ;;  %v623_v25 = vor.u32 %v622_v43, %v621_v4 }
 0x1e8   :  { %v626_v26 = vor.u32 %v625_v39, %v624_v33  ;;  %vm628_vm15 = vcmp.lt.s32.totalorder %v608_v57, 2  ;;  %vm629_vm0 = vcmp.lt.s32.totalorder %v608_v57, 3  ;;  %vm630_vm1 = vcmp.lt.s32.totalorder %v608_v57, 4 }
 0x1e9   :  { %v862_v32 = vsel %vm860_vm13, %v861_v17, %v1759_v2  ;;  %v631_v49 = vsel %vm627_vm14, %v611_v23, %v614_v63  ;;  %v635_v51 = vsel %vm627_vm14, %v614_v63, %v617_v8  ;;  %v632_v0 = vsel %vm630_vm1, %v620_v46, 2102212464 }
 0x1ea   :  { %v863_v21 = vadd.s32 %v862_v32, %v858_v9  ;;  %v636_v29 = vsel %vm630_vm1, %v623_v25, 920167782  ;;  %v639_v13 = vsel %vm627_vm14, %v617_v8, %v620_v46  ;;  %v633_v28 = vsel %vm629_vm0, %v617_v8, %v632_v0 }
 0x1eb   :  { %v637_v36 = vsel %vm629_vm0, %v620_v46, %v636_v29  ;;  %v640_v38 = vsel %vm630_vm1, %v626_v26, 1326507024  ;;  %v915_v50 = vor.u32 8388608, %v1724_v12  ;;  %v634_v52 = vsel %vm628_vm15, %v631_v49, %v633_v28 }
 0x1ec   :  { %v864_v37 = vadd.s32 536870912, %v863_v21  ;;  %v638_v42 = vsel %vm628_vm15, %v635_v51, %v637_v36  ;;  %v641_v24 = vsel %vm629_vm0, %v623_v25, %v640_v38  ;;  %v919_v7 = vsel %vm918_vm2, %v1730_v34, 0 }
 0x1ed   :  { %v642_v31 = vsel %vm628_vm15, %v639_v13, %v641_v24  ;;  %v1782_v27 = vmul.u32.u64.low %v1720_v11, %v638_v42  ;;  %v1783_v35 = vmul.u32.u64.high %v1720_v11, %v638_v42, %v1782_v27  ;;  %v921_v40 = vand.u32 31, %v919_v7 }
 0x1ee   :  { %v1786_v10 = vshrl.u32 %v864_v37, 30  ;;  %v1789_v6 = vmul.u32.u64.low %v1720_v11, %v642_v31  ;;  %v1790_v55 = vmul.u32.u64.high %v1720_v11, %v642_v31, %v1789_v6  ;;  %v1794_v60 = vshll.u32 %v915_v50, 8 }
 0x1ef   :  { %v702_v57 = vand.u32 2139095040, %v1726_v16  ;;  %v650_v9 = vmul.u32 %v1720_v11, %v634_v52  ;;  %v653_v59 = vadd.s32 1, %v1783_v35  ;;  %v920_v19 = vshrl.u32 %v919_v7, 5 }
 0x1f0   :  { %v866_v12 = vshll.u32 %v1786_v10, 30  ;;  %v922_v2 = vsub.s32 32, %v921_v40  ;;  %vm652_vm3 = vc.u32 %v1790_v55, %v1782_v27  ;;  %v924_v34 = vshll.u32 %v1240_v20, %v921_v40 }
 0x1f1   :  { %v927_v14 = vshll.u32 %v1241_v22, %v921_v40  ;;  %v654_v45 = vsel %vm652_vm3, %v653_v59, %v1783_v35  ;;  %v930_v11 = vshll.u32 %v1242_v30, %v921_v40  ;;  %v933_v63 = vshll.u32 %v1238_v56, %v921_v40 }
 0x1f2   :  { %v1799_v23 = vsub.s32 %v863_v21, %v866_v12  ;;  %v925_v61 = vshrl.u32 %v1241_v22, %v922_v2  ;;  %v928_v1 = vshrl.u32 %v1242_v30, %v922_v2  ;;  %v655_v4 = vadd.s32 %v654_v45, %v650_v9 }
 0x1f3   :  { %v931_v43 = vshrl.u32 %v1238_v56, %v922_v2  ;;  %v934_v39 = vshrl.u32 %v1237_v48, %v922_v2  ;;  %v936_v17 = vshll.u32 %v1237_v48, %v921_v40  ;;  %v937_v32 = vshrl.u32 %v1239_v58, %v922_v2 }
 0x1f4   :  { %v869_v3 = vsub.s32 0, %v1799_v23  ;;  %v926_v8 = vor.u32 %v925_v61, %v924_v34  ;;  %v929_v33 = vor.u32 %v928_v1, %v927_v14  ;;  %v656_v25 = vadd.s32 536870912, %v655_v4 }
 0x1f5   :  { %v932_v26 = vor.u32 %v931_v43, %v930_v11  ;;  %v923_v49 = vshrl.u32 %v1240_v20, %v922_v2  ;;  %v935_v51 = vor.u32 %v934_v39, %v933_v63  ;;  %vm939_vm4 = vcmp.lt.s32.totalorder %v920_v19, 1 }
 0x1f6   :  { %v1107_v46 = vmin.u32 %v869_v3, %v1799_v23  ;;  %v703_v21 = vshrl.u32 %v702_v57, 23  ;;  %v1817_v29 = vshrl.u32 %v656_v25, 30  ;;  %v938_v13 = vor.u32 %v937_v32, %v936_v17 }
 0x1f7   :  { %vm942_vm5 = vcmp.lt.s32.totalorder %v920_v19, 4  ;;  %vm941_vm6 = vcmp.lt.s32.totalorder %v920_v19, 3  ;;  %v947_v36 = vsel %vm939_vm4, %v926_v8, %v929_v33  ;;  %vm940_vm7 = vcmp.lt.s32.totalorder %v920_v19, 2 }
 0x1f8   :  { %v871_v0 = vclz %v1107_v46  ;;  %v944_v28 = vsel %vm942_vm5, %v932_v26, 2102212464  ;;  %v948_v38 = vsel %vm942_vm5, %v935_v51, 920167782  ;;  %v658_v42 = vshll.u32 %v1817_v29, 30 }
 0x1f9   :  { %v949_v24 = vsel %vm941_vm6, %v932_v26, %v948_v38  ;;  %v943_v50 = vsel %vm939_vm4, %v923_v49, %v926_v8  ;;  %v951_v31 = vsel %vm939_vm4, %v929_v33, %v932_v26  ;;  %v952_v35 = vsel %vm942_vm5, %v938_v13, 1326507024 }
 0x1fa   :  { %v1108_v37 = vadd.s32 4294967294, %v871_v0  ;;  %v950_v52 = vsel %vm940_vm7, %v947_v36, %v949_v24  ;;  %v1824_v6 = vsub.s32 %v655_v4, %v658_v42  ;;  %v945_v7 = vsel %vm941_vm6, %v929_v33, %v944_v28 }
 0x1fb   :  { %v953_v40 = vsel %vm941_vm6, %v935_v51, %v952_v35  ;;  %v1828_v9 = vmul.u32.u64.low %v1794_v60, %v950_v52  ;;  %v1829_v59 = vmul.u32.u64.high %v1794_v60, %v950_v52, %v1828_v9  ;;  %v1102_v1 = vadd.s32 4294967169, %v703_v21 }
 0x1fc   :  { %vm1109_vm8 = vcmp.lt.s32.totalorder %v1108_v37, 0  ;;  %v954_v57 = vsel %vm940_vm7, %v951_v31, %v953_v40  ;;  %v661_v14 = vsub.s32 0, %v1824_v6  ;;  %v859_v11 = vadd.s32 %v1758_v62, %v1755_v54 }
 0x1fd   :  { %v874_v12 = vsel %vm1109_vm8, 0, %v1108_v37  ;;  %v1834_v45 = vmul.u32.u64.low %v1794_v60, %v954_v57  ;;  %v1835_v61 = vmul.u32.u64.high %v1794_v60, %v954_v57, %v1834_v45  ;;  %v946_v4 = vsel %vm940_vm7, %v943_v50, %v945_v7 }
 0x1fe   :  { %v875_v2 = vsub.s32 32, %v874_v12  ;;  %v879_v34 = vsub.s32 4294967266, %v874_v12  ;;  %v1099_v43 = vmin.u32 %v661_v14, %v1824_v6  ;;  %v965_v63 = vadd.s32 1, %v1829_v59 }
 0x1ff   :  { %v709_v8 = vadd.s32 1, %v1102_v1  ;;  %v699_v39 = vand.u32 2147483647, %v1726_v16  ;;  %v962_v17 = vmul.u32 %v1794_v60, %v946_v4  ;;  %vm964_vm9 = vc.u32 %v1835_v61, %v1828_v9 }
 0x200   :  { %v880_v3 = vadd.s32 127, %v879_v34  ;;  %v877_v33 = vshrl.u32 %v859_v11, %v875_v2  ;;  %v876_v46 = vshll.u32 %v1799_v23, %v874_v12  ;;  %v966_v62 = vsel %vm964_vm9, %v965_v63, %v1829_v59 }
 0x201   :  { %vm710_vm10 = vcmp.gt.s32.totalorder %v709_v8, 0  ;;  %v663_v19 = vclz %v1099_v43  ;;  %v967_v25 = vadd.s32 %v966_v62, %v962_v17  ;;  %v706_v49 = vand.u32 8388607, %v699_v39 }
 0x202   :  { %v881_v54 = vshll.u32 %v880_v3, 23  ;;  %v711_v26 = vsel %vm710_vm10, %v709_v8, 0  ;;  %v878_v32 = vor.u32 %v877_v33, %v876_v46  ;;  %vm805_vm2 = vcmp.lt.s32.totalorder %v1702_v53, 0 }
 0x203   :  { %v713_v51 = vand.u32 31, %v711_v26  ;;  %v968_v21 = vadd.s32 536870912, %v967_v25  ;;  %v1100_v60 = vadd.s32 4294967294, %v663_v19  ;;  %v707_v38 = vor.u32 8388608, %v706_v49 }
 0x204   :  { %v882_v0 = vor.u32 4788187, %v881_v54  ;;  %v885_v36 = vcvt.s32.f32 %v878_v32  ;;  %v712_v40 = vshrl.u32 %v711_v26, 5  ;;  %vm1886_vm4 = vcmp.le.f32.partialorder %v803_v47, 0.7853982 }
 0x205   :  { %v1850_v13 = vshrl.u32 %v968_v21, 30  ;;  %v714_v28 = vsub.s32 32, %v713_v51  ;;  %v716_v37 = vshll.u32 %v1240_v20, %v713_v51  ;;  %v719_v52 = vshll.u32 %v1241_v22, %v713_v51 }
 0x206   :  { %v883_v50 = vand.u32 2147483647, %v882_v0  ;;  %v722_v31 = vshll.u32 %v1242_v30, %v713_v51  ;;  %vm1101_vm12 = vcmp.lt.s32.totalorder %v1100_v60, 0  ;;  %v725_v2 = vshll.u32 %v1238_v56, %v713_v51 }
 0x207   :  { %v970_v23 = vshll.u32 %v1850_v13, 30  ;;  %v717_v42 = vshrl.u32 %v1241_v22, %v714_v28  ;;  %v720_v24 = vshrl.u32 %v1242_v30, %v714_v28  ;;  %v723_v35 = vshrl.u32 %v1238_v56, %v714_v28 }
 0x208   :  { %v726_v34 = vshrl.u32 %v1237_v48, %v714_v28  ;;  %v728_v45 = vshll.u32 %v1237_v48, %v713_v51  ;;  %v729_v1 = vshrl.u32 %v1239_v58, %v714_v28  ;;  %v747_v22 = vshll.u32 %v707_v38, 8 }
 0x209   :  { %v971_v7 = vsub.s32 %v967_v25, %v970_v23  ;;  %v718_v12 = vor.u32 %v717_v42, %v716_v37  ;;  %v721_v57 = vor.u32 %v720_v24, %v719_v52  ;;  %v724_v59 = vor.u32 %v723_v35, %v722_v31 }
 0x20a   :  { %v886_v11 = vmul.f32 %v885_v36, %v883_v50  ;;  %v1863_v30 = vsel %vm1101_vm12, 0, %v1100_v60  ;;  %v715_v3 = vshrl.u32 %v1240_v20, %v714_v28  ;;  %v727_v4 = vor.u32 %v726_v34, %v725_v2 }
 0x20b   :  { %v973_v14 = vsub.s32 0, %v971_v7  ;;  %v730_v63 = vor.u32 %v729_v1, %v728_v45  ;;  %vm731_vm13 = vcmp.lt.s32.totalorder %v712_v40, 1  ;;  %vm734_vm14 = vcmp.lt.s32.totalorder %v712_v40, 4 }
 0x20c   :  { %vm733_vm15 = vcmp.lt.s32.totalorder %v712_v40, 3  ;;  %v736_v56 = vsel %vm734_vm14, %v724_v59, 2102212464  ;;  %v739_v8 = vsel %vm731_vm13, %v718_v12, %v721_v57  ;;  %v740_v33 = vsel %vm734_vm14, %v727_v4, 920167782 }
 0x20d   :  { %v1111_v43 = vmin.u32 %v973_v14, %v971_v7  ;;  %vm732_vm0 = vcmp.lt.s32.totalorder %v712_v40, 2  ;;  %v741_v48 = vsel %vm733_vm15, %v724_v59, %v740_v33  ;;  %v743_v46 = vsel %vm731_vm13, %v721_v57, %v724_v59 }
 0x20e   :  { %v735_v58 = vsel %vm731_vm13, %v715_v3, %v718_v12  ;;  %v737_v54 = vsel %vm733_vm15, %v721_v57, %v736_v56  ;;  %v742_v62 = vsel %vm732_vm0, %v739_v8, %v741_v48  ;;  %v744_v19 = vsel %vm734_vm14, %v730_v63, 1326507024 }
 0x20f   :  { %v975_v17 = vclz %v1111_v43  ;;  %v745_v26 = vsel %vm733_vm15, %v727_v4, %v744_v19  ;;  %v1866_v20 = vmul.u32.u64.low %v747_v22, %v742_v62  ;;  %v1867_v32 = vmul.u32.u64.high %v747_v22, %v742_v62, %v1866_v20 }
 0x210   :  { %v887_v49 = vxor.u32 2147483648, %v886_v11  ;;  %v671_v51 = vsub.s32 4294967266, %v1863_v30  ;;  %v746_v21 = vsel %vm732_vm0, %v743_v46, %v745_v26  ;;  %v738_v0 = vsel %vm732_vm0, %v735_v58, %v737_v54 }
 0x211   :  { %v1112_v25 = vadd.s32 4294967294, %v975_v17  ;;  %v1871_v60 = vmul.u32.u64.low %v747_v22, %v746_v21  ;;  %v1872_v28 = vmul.u32.u64.high %v747_v22, %v746_v21, %v1871_v60  ;;  %v963_v38 = vadd.s32 %v1828_v9, %v1835_v61 }
 0x212   :  { %v888_v42 = vsel %vm805_vm2, %v887_v49, %v886_v11  ;;  %v672_v24 = vadd.s32 127, %v671_v51  ;;  %v754_v50 = vmul.u32 %v747_v22, %v738_v0  ;;  %v757_v52 = vadd.s32 1, %v1867_v32 }
 0x213   :  { %vm1113_vm1 = vcmp.lt.s32.totalorder %v1112_v25, 0  ;;  %vm756_vm3 = vc.u32 %v1872_v28, %v1866_v20  ;;  %v667_v12 = vsub.s32 32, %v1863_v30  ;;  %v891_v14 = vsel %vm1886_vm4, %v1702_v53, %v888_v42 }
 0x214   :  { %v978_v36 = vsel %vm1113_vm1, 0, %v1112_v25  ;;  %v758_v57 = vsel %vm756_vm3, %v757_v52, %v1867_v32  ;;  %v673_v34 = vshll.u32 %v672_v24, 23  ;;  %vm1244_vm5 = vmmov 0  }
 0x215   :  { %v979_v23 = vsub.s32 32, %v978_v36  ;;  %v983_v37 = vsub.s32 4294967266, %v978_v36  ;;  %v980_v31 = vshll.u32 %v971_v7, %v978_v36  ;;  %v759_v59 = vadd.s32 %v758_v57, %v754_v50  ;;  %1134 = vmatprep.mubr.msk.bf16.mxu1 %vm1244_vm5, %v1243_v18 }
 0x216   :  { %v651_v7 = vadd.s32 %v1782_v27, %v1790_v55  ;;  %1198 = vcosq.f32 %v891_v14  ;;  %v668_v4 = vshll.u32 %v1824_v6, %v1863_v30  ;;  %v674_v27 = vor.u32 4788187, %v673_v34 }
 0x217   :  { %v981_v35 = vshrl.u32 %v963_v38, %v979_v23  ;;  %v984_v40 = vadd.s32 127, %v983_v37  ;;  %v760_v1 = vadd.s32 536870912, %v759_v59  ;;  %v889_v55 = vsub.s32 4, %v1786_v10 }
 0x218   :  { %v669_v22 = vshrl.u32 %v651_v7, %v667_v12  ;;  %1200 = vsinq.f32 %v891_v14  ;;  %v675_v17 = vand.u32 2147483647, %v674_v27  ;;  %vm909_vm6 = vcmp.lt.s32.totalorder %v1712_v5, 0 }
 0x219   :  { %v982_v9 = vor.u32 %v981_v35, %v980_v31  ;;  %v985_v61 = vshll.u32 %v984_v40, 23  ;;  %v1896_v47 = vshrl.u32 %v760_v1, 30  ;;  %v890_v48 = vsel %vm805_vm2, %v889_v55, %v1786_v10 }
 0x21a   :  { %v670_v56 = vor.u32 %v669_v22, %v668_v4  ;;  %v993_v46 = vsub.s32 4, %v1850_v13  ;;  %vm1909_vm7 = vcmp.le.f32.partialorder %v907_v41, 0.7853982  ;;  %v892_v25 = vsel %vm1886_vm4, 0, %v890_v48 }
 0x21b   :  { %v986_v45 = vor.u32 4788187, %v985_v61  ;;  %v989_v3 = vcvt.s32.f32 %v982_v9  ;;  %v762_v63 = vshll.u32 %v1896_v47, 30  ;;  %v896_v49 = vadd.s32 3, %v892_v25 }
 0x21c   :  { %v677_v54 = vcvt.s32.f32 %v670_v56  ;;  %v994_v26 = vsel %vm909_vm6, %v993_v46, %v1850_v13  ;;  %vm597_vm9 = vcmp.lt.s32.totalorder %v1706_v44, 0  ;;  %v755_v37 = vadd.s32 %v1866_v20, %v1872_v28 }
 0x21d   :  { %v987_v11 = vand.u32 2147483647, %v986_v45  ;;  %v763_v33 = vsub.s32 %v759_v59, %v762_v63  ;;  %v996_v51 = vsel %vm1909_vm7, 0, %v994_v26  ;;  %v897_v38 = vand.u32 3, %v896_v49 }
 0x21e   :  { %v678_v10 = vmul.f32 %v677_v54, %v675_v17  ;;  %v1000_v23 = vadd.s32 3, %v996_v51  ;;  %vm1928_vm10 = vcmp.le.f32.partialorder %v595_v15, 0.7853982  ;;  %vm895_vm1 = vweird.f32 %v1702_v53 }
 0x21f   :  { %v990_v43 = vmul.f32 %v989_v3, %v987_v11  ;;  %v765_v30 = vsub.s32 0, %v763_v33  ;;  %vm899_vm12 = vcmp.eq.s32.totalorder %v897_v38, 0  ;;  %vm902_vm13 = vcmp.eq.s32.totalorder %v897_v38, 2 }
 0x220   :  { %v679_v0 = vxor.u32 2147483648, %v678_v10  ;;  %v1001_v57 = vand.u32 3, %v1000_v23  ;;  %vm898_vm14 = vcmp.lt.s32.totalorder %v897_v38, 2  ;;  %vm999_vm3 = vweird.f32 %v1712_v5 }
 0x221   :  { %v991_v8 = vxor.u32 2147483648, %v990_v43  ;;  %v1103_v19 = vmin.u32 %v765_v30, %v763_v33  ;;  %v681_v55 = vsub.s32 4, %v1817_v29  ;;  %vm701_vm4 = vcmp.lt.s32.totalorder %v1726_v16, 0 }
 0x222   :  { %v680_v24 = vsel %vm597_vm9, %v679_v0, %v678_v10  ;;  %vm1003_vm15 = vcmp.eq.s32.totalorder %v1001_v57, 0  ;;  %vm1006_vm0 = vcmp.eq.s32.totalorder %v1001_v57, 2  ;;  %vm1002_vm2 = vcmp.lt.s32.totalorder %v1001_v57, 2 }
 0x223   :  { %v992_v6 = vsel %vm909_vm6, %v991_v8, %v990_v43  ;;  %v767_v32 = vclz %v1103_v19  ;;  %v1199_v21 = vpop.eup %1198  ;;  %v683_v20 = vsel %vm1928_vm10, %v1706_v44, %v680_v24  ;;  %vm700_vm5 = vcmp.le.f32.partialorder %v699_v39, 0.7853982 }
 0x224   :  { %v995_v62 = vsel %vm1909_vm7, %v1712_v5, %v992_v6  ;;  %v903_v52 = vxor.u32 2147483648, %v1199_v21  ;;  %v682_v5 = vsel %vm597_vm9, %v681_v55, %v1817_v29 }
 0x225   :  { %1202 = vcosq.f32 %v995_v62  ;;  %v1104_v41 = vadd.s32 4294967294, %v767_v32  ;;  %v1201_v60 = vpop.eup %1200  ;;  %v684_v48 = vsel %vm1928_vm10, 0, %v682_v5 }
 0x226   :  { %1204 = vsinq.f32 %v995_v62  ;;  %v900_v50 = vxor.u32 2147483648, %v1201_v60  ;;  %v904_v2 = vsel %vm902_vm13, %v903_v52, %v1201_v60  ;;  %v688_v30 = vadd.s32 3, %v684_v48  ;;  %v1011_v60 = vld [vmem:[%s1964_s5] sm:$0xf] }
 0x227   :  { %vm1105_vm8 = vcmp.lt.s32.totalorder %v1104_v41, 0  ;;  %1206 = vcosq.f32 %v683_v20  ;;  %vm687_vm13 = vweird.f32 %v1706_v44 }
 0x228   :  { %v770_v36 = vsel %vm1105_vm8, 0, %v1104_v41  ;;  %v901_v59 = vsel %vm899_vm12, %v1199_v21, %v900_v50  ;;  %1208 = vsinq.f32 %v683_v20  ;;  %v689_v62 = vand.u32 3, %v688_v30 }
 0x229   :  { %v771_v13 = vsub.s32 32, %v770_v36  ;;  %v775_v42 = vsub.s32 4294967266, %v770_v36  ;;  %v772_v31 = vshll.u32 %v763_v33, %v770_v36  ;;  %v905_v22 = vsel %vm898_vm14, %v901_v59, %v904_v2 }
 0x22a   :  { %v906_v43 = vsel %vm895_vm1, nan, %v905_v22  ;;  %v785_v33 = vsub.s32 4, %v1896_v47  ;;  %vm691_vm6 = vcmp.eq.s32.totalorder %v689_v62, 0  ;;  %vm694_vm7 = vcmp.eq.s32.totalorder %v689_v62, 2 }
 0x22b   :  { %v773_v35 = vshrl.u32 %v755_v37, %v771_v13  ;;  %v776_v40 = vadd.s32 127, %v775_v42  ;;  %vm690_vm8 = vcmp.lt.s32.totalorder %v689_v62, 2  ;;  %vm791_vm14 = vweird.f32 %v1726_v16  ;;  %v1019_v13 = vpop.permute.xlu0 %1018 }
 0x22c   :  { %v786_v46 = vsel %vm701_vm4, %v785_v33, %v1896_v47  ;;  %v1013_v37 = vpack.c.bf16 %v1011_v60, %v1011_v60 }
 0x22d   :  { %v774_v28 = vor.u32 %v773_v35, %v772_v31  ;;  %v777_v9 = vshll.u32 %v776_v40, 23  ;;  %v788_v39 = vsel %vm700_vm5, 0, %v786_v46 }
 0x22e   :  { %v792_v54 = vadd.s32 3, %v788_v39 }
 0x22f   :  { %v778_v34 = vor.u32 4788187, %v777_v9  ;;  %v781_v1 = vcvt.s32.f32 %v774_v28 }
 0x230   :  { %v793_v29 = vand.u32 3, %v792_v54 }
 0x231   :  { %v779_v45 = vand.u32 2147483647, %v778_v34 }
 0x232   :  { %v1203_v61 = vpop.eup %1202  ;;  %vm798_vm9 = vcmp.eq.s32.totalorder %v793_v29, 2  ;;  %vm795_vm10 = vcmp.eq.s32.totalorder %v793_v29, 0  ;;  %vm794_vm12 = vcmp.lt.s32.totalorder %v793_v29, 2 }
 0x233   :  { %v1205_v7 = vpop.eup %1204  ;;  %v1007_v14 = vxor.u32 2147483648, %v1203_v61  ;;  %v782_v4 = vmul.f32 %v781_v1, %v779_v45 }
 0x234   :  { %v1004_v15 = vxor.u32 2147483648, %v1205_v7  ;;  %v1207_v6 = vpop.eup %1206 }
 0x235   :  { %v1008_v11 = vsel %vm1006_vm0, %v1007_v14, %v1205_v7  ;;  %v783_v56 = vxor.u32 2147483648, %v782_v4  ;;  %v1209_v58 = vpop.eup %1208  ;;  %v695_v25 = vxor.u32 2147483648, %v1207_v6 }
 0x236   :  { %v1005_v3 = vsel %vm1003_vm15, %v1203_v61, %v1004_v15  ;;  %v692_v19 = vxor.u32 2147483648, %v1209_v58 }
 0x237   :  { %v1009_v27 = vsel %vm1002_vm2, %v1005_v3, %v1008_v11  ;;  %v784_v53 = vsel %vm701_vm4, %v783_v56, %v782_v4  ;;  %v696_v26 = vsel %vm694_vm7, %v695_v25, %v1209_v58 }
 0x238   :  { %v1010_v63 = vsel %vm999_vm3, nan, %v1009_v27  ;;  %v787_v17 = vsel %vm700_vm5, %v1726_v16, %v784_v53 }
 0x239   :  { %v1015_v8 = vpack.c.bf16 %v1010_v63, %v906_v43  ;;  %1210 = vcosq.f32 %v787_v17 }
 0x23a   :  { %1212 = vsinq.f32 %v787_v17 }
 0x23b   :  { %1131 = vmatpush3.bf16.msra.mxu1 %v1015_v8 }
 0x23c   :  { %1132 = vmatprep.subr.bf16.mxu1 %v1243_v18  ;;  %v693_v18 = vsel %vm691_vm6, %v1207_v6, %v692_v19 }
 0x23d   :  { %v697_v47 = vsel %vm690_vm8, %v693_v18, %v696_v26 }
 0x23e   :  { %v698_v36 = vsel %vm687_vm13, nan, %v697_v47 }
 0x246   :  { %v1211_v10 = vpop.eup %1210 }
 0x247   :  { %v1213_v32 = vpop.eup %1212  ;;  %v799_v49 = vxor.u32 2147483648, %v1211_v10 }
 0x248   :  { %v796_v41 = vxor.u32 2147483648, %v1213_v32 }
 0x249   :  { %v800_v51 = vsel %vm798_vm9, %v799_v49, %v1213_v32 }
 0x24a   :  { %v797_v21 = vsel %vm795_vm10, %v1211_v10, %v796_v41 }
 0x24b   :  { %v801_v0 = vsel %vm794_vm12, %v797_v21, %v800_v51 }
 0x24c   :  { %v802_v38 = vsel %vm791_vm14, nan, %v801_v0 }
 0x24d   :  { %v1014_v23 = vpack.c.bf16 %v802_v38, %v698_v36 }
 0x24f   :  { %1133 = vmatpush3.bf16.msra.mxu1 %v1014_v23 }
 0x252   :  { %1135 = vmatmul.mubr.msk.bf16.vlgmr.msra.gmra.mxu1 %vm539_vm11, %v1013_v37 }
 0x312   :  { %v1058_v42 = vpop.f32.mrf.mxu1 }
 0x313   :  { %v1059_v24 = vadd.f32 %v1058_v42, %v1019_v13 }
 0x314   :  { %v1136_v44 = vpop.f32.mrf.mxu1 }
 0x315   :  { %1064 = vst [vmem:[#allocation2] sm:$0xf] %v1059_v24 }
 0x316   :  { %v1061_v16 = vpop.f32.mrf.mxu1 }
 0x317   :  { %1225 = shalt.err (!%p1222_p4)
}
 0x318   :  { %1074 = dma.vmem_to_hbm [thread:$0]  %s1072_s11, 64, %s1966_s7, [#allocation3]   ;;  %v1137_v50 = vpop.f32.mrf.mxu1 }
 0x319   :  { %1234 = dma.done.wait [#allocation3], 64  }
 0x31a   :  { %1235 = vsyncadd [#allocation3], 4294967232 }
 0x31b   :  { %1078 = vsyncpa [#allocation3], 1 }

</bundles_post_ra>
